<compile_context>
chip_gen: v6e
topology: v6e:2x2x1
jax: 0.10.0
libtpu: 0.0.40
codegen_flags: <defaults>
</compile_context>

<pallas_src>
import functools

import jax
import jax.numpy as jnp
from jax.experimental import pallas as pl
from jax.experimental.pallas import tpu as pltpu

LANE = 128  # TPU lane width


def _round_up(n, m):
    return ((n + m - 1) // m) * m


# --------------------------------------------------------------------------
# Kernel
# --------------------------------------------------------------------------
def _generator_kernel(x_ref, w1_ref, b1_ref, w2_ref, b2_ref, w3_ref, b3_ref,
                      out_ref):
    # x streamed as f32 (narrow, un-padded feature dim); cast to bf16 for MXU.
    x = x_ref[...].astype(jnp.bfloat16)

    # ---- map1 + ELU (alpha = 1.0, PyTorch default) ----
    h1 = jnp.dot(x, w1_ref[...], preferred_element_type=jnp.float32)
    h1 = h1 + b1_ref[...]                                   # f32 bias add
    # Clamp the exp argument so the discarded branch never produces inf.
    h1 = jnp.where(h1 > 0, h1, jnp.exp(jnp.minimum(h1, 0.0)) - 1.0)

    # ---- map2 + sigmoid (EUP exp + EUP approx reciprocal) ----
    h2 = jnp.dot(h1.astype(jnp.bfloat16), w2_ref[...],
                 preferred_element_type=jnp.float32)
    h2 = h2 + b2_ref[...]
    h2 = pl.reciprocal(1.0 + jnp.exp(-h2), approx=True)

    # ---- map3 (no activation) ----
    y = jnp.dot(h2.astype(jnp.bfloat16), w3_ref[...],
                preferred_element_type=jnp.float32)
    y = y + b3_ref[...]

    out_ref[...] = y.astype(out_ref.dtype)


# --------------------------------------------------------------------------
# One-time parameter preparation (hoisted out of the per-call path).
# --------------------------------------------------------------------------
def prepare_params(params):
    """Pad the hidden dim to 128 lanes with zeros and cast weights to bf16.

    Call ONCE and reuse the result across forward calls.  Zero padding is
    exact: padded hidden lanes reach sigmoid(0)=0.5 but multiply zero rows of
    W3, contributing exactly 0 to the real outputs.
    """
    w1, b1, w2, b2, w3, b3 = (params["w1"], params["b1"], params["w2"],
                              params["b2"], params["w3"], params["b3"])
    in_size, hidden = w1.shape
    out_size = w3.shape[1]
    hid_p = _round_up(hidden, LANE)

    bf16, f32 = jnp.bfloat16, jnp.float32

    def pad2(a, shape, dtype):
        z = jnp.zeros(shape, dtype)
        return z.at[:a.shape[0], :a.shape[1]].set(a.astype(dtype))

    return {
        "w1": pad2(w1, (in_size, hid_p), bf16),
        "b1": pad2(jnp.reshape(b1, (1, -1)), (1, hid_p), f32),
        "w2": pad2(w2, (hid_p, hid_p), bf16),
        "b2": pad2(jnp.reshape(b2, (1, -1)), (1, hid_p), f32),
        "w3": pad2(w3, (hid_p, out_size), bf16),
        "b3": jnp.reshape(jnp.asarray(b3, f32), (1, out_size)),
    }


def _pick_tile_b(B, tile_b):
    """Batch tile: multiple of 16, capped at tile_b.  When the batch is big
    enough to split but would fit in a single tile, shrink the tile so the
    grid has >=2 steps (both v7x TensorCores get work)."""
    bp16 = _round_up(B, 16)
    tb = min(tile_b, bp16)
    if bp16 <= tb and bp16 >= 32:
        tb = _round_up((bp16 + 1) // 2, 16)
    return tb


# --------------------------------------------------------------------------
# Forward pass (jitted; only the pallas_call + trivial batch pad per call).
# --------------------------------------------------------------------------
@functools.partial(jax.jit, static_argnames=("tile_b",))
def generator_forward(x, pparams, *, tile_b=512):
    """x: (B, input_size) f32.  pparams: output of prepare_params()."""
    w1, b1, w2, b2, w3, b3 = (pparams["w1"], pparams["b1"], pparams["w2"],
                              pparams["b2"], pparams["w3"], pparams["b3"])
    B, in_size = x.shape
    hid_p = w1.shape[1]
    out_size = w3.shape[1]

    tb = _pick_tile_b(B, tile_b)
    b_p = _round_up(B, tb)
    grid = (b_p // tb,)

    x_p = x.astype(jnp.float32)
    if b_p != B:
        x_p = jnp.pad(x_p, ((0, b_p - B), (0, 0)))

    cost = pl.CostEstimate(
        flops=2 * b_p * (in_size * hid_p + hid_p * hid_p + hid_p * out_size),
        transcendentals=3 * b_p * hid_p,
        bytes_accessed=(b_p * in_size * 4 + b_p * out_size * 4
                        + (w1.size + w2.size + w3.size) * 2
                        + (b1.size + b2.size + b3.size) * 4),
    )

    out = pl.pallas_call(
        _generator_kernel,
        out_shape=jax.ShapeDtypeStruct((b_p, out_size), jnp.float32),
        grid=grid,
        in_specs=[
            pl.BlockSpec((tb, in_size), lambda i: (i, 0)),     # x: blocked rows
            pl.BlockSpec((in_size, hid_p), lambda i: (0, 0)),  # w1: resident
            pl.BlockSpec((1, hid_p), lambda i: (0, 0)),        # b1: resident
            pl.BlockSpec((hid_p, hid_p), lambda i: (0, 0)),    # w2: resident
            pl.BlockSpec((1, hid_p), lambda i: (0, 0)),        # b2: resident
            pl.BlockSpec((hid_p, out_size), lambda i: (0, 0)), # w3: resident
            pl.BlockSpec((1, out_size), lambda i: (0, 0)),     # b3: resident
        ],
        out_specs=pl.BlockSpec((tb, out_size), lambda i: (i, 0)),
        compiler_params=pltpu.CompilerParams(
            dimension_semantics=("parallel",)),
        cost_estimate=cost,
    )(x_p, w1, b1, w2, b2, w3, b3)

    return out if b_p == B else out[:B]


# --------------------------------------------------------------------------
# Param init + references
# --------------------------------------------------------------------------
def init_params(key, input_size, hidden_size, output_size):
    """Deterministic synthetic init (uniform, a la PyTorch Linear default),
    with weights stored transposed as (in, out) for the kernel."""
    ks = jax.random.split(key, 6)

    def lin(kw, kb, fan_in, fan_out):
        bound = 1.0 / jnp.sqrt(fan_in)
        w = jax.random.uniform(kw, (fan_in, fan_out), jnp.float32, -bound, bound)
        b = jax.random.uniform(kb, (1, fan_out), jnp.float32, -bound, bound)
        return w, b

    w1, b1 = lin(ks[0], ks[1], input_size, hidden_size)
    w2, b2 = lin(ks[2], ks[3], hidden_size, hidden_size)
    w3, b3 = lin(ks[4], ks[5], hidden_size, output_size)
    return {"w1": w1, "b1": b1, "w2": w2, "b2": b2, "w3": w3, "b3": b3}


def _reference_f32(x, p):
    h1 = jax.nn.elu(x @ p["w1"] + p["b1"])
    h2 = jax.nn.sigmoid(h1 @ p["w2"] + p["b2"])
    return h2 @ p["w3"] + p["b3"]


def _reference_bf16(x, p):
    """Mirrors the kernel numerics: bf16 matmul operands, f32 accumulation
    (exact sigmoid reciprocal; the kernel's approx rcp differs by ~1e-4)."""
    bf16 = jnp.bfloat16
    h1 = jnp.dot(x.astype(bf16), p["w1"].astype(bf16),
                 preferred_element_type=jnp.float32) + p["b1"]
    h1 = jnp.where(h1 > 0, h1, jnp.exp(jnp.minimum(h1, 0.0)) - 1.0)
    h2 = jnp.dot(h1.astype(bf16), p["w2"].astype(bf16),
                 preferred_element_type=jnp.float32) + p["b2"]
    h2 = 1.0 / (1.0 + jnp.exp(-h2))
    y = jnp.dot(h2.astype(bf16), p["w3"].astype(bf16),
                preferred_element_type=jnp.float32) + p["b3"]
    return y


if __name__ == "__main__":
    input_size, hidden_size, output_size = 16, 32, 8
    batch = 8

    key = jax.random.PRNGKey(0)
    k_x, k_p = jax.random.split(key)
    x = jax.random.normal(k_x, (batch, input_size), jnp.float32)
    params = init_params(k_p, input_size, hidden_size, output_size)

    # One-time param prep; reused across calls.
    pparams = jax.tree_util.tree_map(jax.block_until_ready,
                                     prepare_params(params))

    out = generator_forward(x, pparams)
    out = jax.block_until_ready(out)
    assert out.shape == (batch, output_size)

    # Check against a reference with matching bf16-operand numerics
    # (tolerance covers the approx EUP reciprocal in the kernel's sigmoid).
    ref_bf16 = _reference_bf16(x, params)
    assert jnp.allclose(out, ref_bf16, atol=5e-3, rtol=1e-3), (
        jnp.max(jnp.abs(out - ref_bf16)))

    # Loose check against the pure-f32 reference (bf16 operand quantization).
    ref_f32 = _reference_f32(x, params)
    assert jnp.allclose(out, ref_f32, atol=5e-2, rtol=5e-2), (
        jnp.max(jnp.abs(out - ref_f32)))

    print("KERNEL_OK")
</pallas_src>

<mosaic_0001>
module attributes {stable_mosaic.version = 11 : i64} {
  func.func @_generator_kernel(%arg0: i32, %arg1: memref<16x16xf32, #tpu.memory_space<vmem>>, %arg2: memref<16x128xbf16, #tpu.memory_space<vmem>>, %arg3: memref<1x128xf32, #tpu.memory_space<vmem>>, %arg4: memref<128x128xbf16, #tpu.memory_space<vmem>>, %arg5: memref<1x128xf32, #tpu.memory_space<vmem>>, %arg6: memref<128x8xbf16, #tpu.memory_space<vmem>>, %arg7: memref<1x8xf32, #tpu.memory_space<vmem>>, %arg8: memref<16x8xf32, #tpu.memory_space<vmem>>) attributes {dimension_semantics = [#tpu.dimension_semantics<parallel>], iteration_bounds = array<i64: 1>, scalar_prefetch = 0 : i64, scratch_operands = 0 : i64, tpu.core_type = #tpu.core_type<tc>, window_params = [{transform_indices = @transform_0, window_bounds = array<i64: 16, 16>}, {pipeline_mode = #tpu.pipeline_mode<synchronous>, transform_indices = @transform_1, window_bounds = array<i64: 16, 128>}, {pipeline_mode = #tpu.pipeline_mode<synchronous>, transform_indices = @transform_2, window_bounds = array<i64: 1, 128>}, {pipeline_mode = #tpu.pipeline_mode<synchronous>, transform_indices = @transform_3, window_bounds = array<i64: 128, 128>}, {pipeline_mode = #tpu.pipeline_mode<synchronous>, transform_indices = @transform_4, window_bounds = array<i64: 1, 128>}, {pipeline_mode = #tpu.pipeline_mode<synchronous>, transform_indices = @transform_5, window_bounds = array<i64: 128, 8>}, {pipeline_mode = #tpu.pipeline_mode<synchronous>, transform_indices = @transform_6, window_bounds = array<i64: 1, 8>}, {transform_indices = @transform_7, window_bounds = array<i64: 16, 8>}]} {
    %c0 = arith.constant 0 : index
    %c0_0 = arith.constant 0 : index
    %0 = vector.load %arg1[%c0, %c0_0] : memref<16x16xf32, #tpu.memory_space<vmem>>, vector<16x16xf32>
    %1 = arith.truncf %0 : vector<16x16xf32> to vector<16x16xbf16>
    %c0_1 = arith.constant 0 : index
    %c0_2 = arith.constant 0 : index
    %2 = vector.load %arg2[%c0_1, %c0_2] : memref<16x128xbf16, #tpu.memory_space<vmem>>, vector<16x128xbf16>
    %cst = arith.constant dense<0.000000e+00> : vector<16x128xf32>
    %3 = tpu.matmul %1, %2, %cst {dimension_numbers = #tpu.dot_dimension_numbers<[1], [0], [0], [1], [0, 0, 1, 1], [], []>} : vector<16x16xbf16>, vector<16x128xbf16>, vector<16x128xf32> -> vector<16x128xf32>
    %c0_3 = arith.constant 0 : index
    %c0_4 = arith.constant 0 : index
    %4 = vector.load %arg3[%c0_3, %c0_4] : memref<1x128xf32, #tpu.memory_space<vmem>>, vector<1x128xf32>
    %5 = vector.broadcast %4 : vector<1x128xf32> to vector<16x128xf32>
    %6 = arith.addf %3, %5 : vector<16x128xf32>
    %cst_5 = arith.constant 0.000000e+00 : f32
    %7 = vector.broadcast %cst_5 : f32 to vector<16x128xf32>
    %8 = arith.cmpf ogt, %6, %7 : vector<16x128xf32>
    %cst_6 = arith.constant 0.000000e+00 : f32
    %9 = vector.broadcast %cst_6 : f32 to vector<16x128xf32>
    %10 = arith.minimumf %6, %9 : vector<16x128xf32>
    %11 = math.exp %10 : vector<16x128xf32>
    %cst_7 = arith.constant 1.000000e+00 : f32
    %12 = vector.broadcast %cst_7 : f32 to vector<16x128xf32>
    %13 = arith.subf %11, %12 : vector<16x128xf32>
    %14 = arith.select %8, %6, %13 : vector<16x128xi1>, vector<16x128xf32>
    %15 = arith.truncf %14 : vector<16x128xf32> to vector<16x128xbf16>
    %c0_8 = arith.constant 0 : index
    %c0_9 = arith.constant 0 : index
    %16 = vector.load %arg4[%c0_8, %c0_9] : memref<128x128xbf16, #tpu.memory_space<vmem>>, vector<128x128xbf16>
    %cst_10 = arith.constant dense<0.000000e+00> : vector<16x128xf32>
    %17 = tpu.matmul %15, %16, %cst_10 {dimension_numbers = #tpu.dot_dimension_numbers<[1], [0], [0], [1], [0, 0, 1, 1], [], []>} : vector<16x128xbf16>, vector<128x128xbf16>, vector<16x128xf32> -> vector<16x128xf32>
    %c0_11 = arith.constant 0 : index
    %c0_12 = arith.constant 0 : index
    %18 = vector.load %arg5[%c0_11, %c0_12] : memref<1x128xf32, #tpu.memory_space<vmem>>, vector<1x128xf32>
    %19 = vector.broadcast %18 : vector<1x128xf32> to vector<16x128xf32>
    %20 = arith.addf %17, %19 : vector<16x128xf32>
    %cst_13 = arith.constant 0.000000e+00 : f32
    %21 = vector.broadcast %cst_13 : f32 to vector<16x128xf32>
    %22 = arith.subf %21, %20 : vector<16x128xf32>
    %23 = math.exp %22 : vector<16x128xf32>
    %cst_14 = arith.constant 1.000000e+00 : f32
    %24 = vector.broadcast %cst_14 : f32 to vector<16x128xf32>
    %25 = arith.addf %24, %23 : vector<16x128xf32>
    %26 = tpu.reciprocal %25 {approx = true} : vector<16x128xf32> -> vector<16x128xf32>
    %27 = arith.truncf %26 : vector<16x128xf32> to vector<16x128xbf16>
    %c0_15 = arith.constant 0 : index
    %c0_16 = arith.constant 0 : index
    %28 = vector.load %arg6[%c0_15, %c0_16] : memref<128x8xbf16, #tpu.memory_space<vmem>>, vector<128x8xbf16>
    %cst_17 = arith.constant dense<0.000000e+00> : vector<16x8xf32>
    %29 = tpu.matmul %27, %28, %cst_17 {dimension_numbers = #tpu.dot_dimension_numbers<[1], [0], [0], [1], [0, 0, 1, 1], [], []>} : vector<16x128xbf16>, vector<128x8xbf16>, vector<16x8xf32> -> vector<16x8xf32>
    %c0_18 = arith.constant 0 : index
    %c0_19 = arith.constant 0 : index
    %30 = vector.load %arg7[%c0_18, %c0_19] : memref<1x8xf32, #tpu.memory_space<vmem>>, vector<1x8xf32>
    %31 = vector.broadcast %30 : vector<1x8xf32> to vector<16x8xf32>
    %32 = arith.addf %29, %31 : vector<16x8xf32>
    %c0_20 = arith.constant 0 : index
    %c0_21 = arith.constant 0 : index
    %33 = vector.load %arg8[%c0_20, %c0_21] : memref<16x8xf32, #tpu.memory_space<vmem>>, vector<16x8xf32>
    tpu.vector_store %arg8[%c0_20, %c0_21], %32 {strides = array<i32>} : memref<16x8xf32, #tpu.memory_space<vmem>>, vector<16x8xf32>,
    return
  }
  func.func @transform_0(%arg0: i32) -> (i32, i32) {
    %c0_i32 = arith.constant 0 : i32
    %c0_i32_0 = arith.constant 0 : i32
    return %arg0, %c0_i32 : i32, i32
  }
  func.func @transform_1(%arg0: i32) -> (i32, i32) {
    %c0_i32 = arith.constant 0 : i32
    %c0_i32_0 = arith.constant 0 : i32
    %c0_i32_1 = arith.constant 0 : i32
    return %c0_i32, %c0_i32_0 : i32, i32
  }
  func.func @transform_2(%arg0: i32) -> (i32, i32) {
    %c0_i32 = arith.constant 0 : i32
    %c0_i32_0 = arith.constant 0 : i32
    %c0_i32_1 = arith.constant 0 : i32
    return %c0_i32, %c0_i32_0 : i32, i32
  }
  func.func @transform_3(%arg0: i32) -> (i32, i32) {
    %c0_i32 = arith.constant 0 : i32
    %c0_i32_0 = arith.constant 0 : i32
    %c0_i32_1 = arith.constant 0 : i32
    return %c0_i32, %c0_i32_0 : i32, i32
  }
  func.func @transform_4(%arg0: i32) -> (i32, i32) {
    %c0_i32 = arith.constant 0 : i32
    %c0_i32_0 = arith.constant 0 : i32
    %c0_i32_1 = arith.constant 0 : i32
    return %c0_i32, %c0_i32_0 : i32, i32
  }
  func.func @transform_5(%arg0: i32) -> (i32, i32) {
    %c0_i32 = arith.constant 0 : i32
    %c0_i32_0 = arith.constant 0 : i32
    %c0_i32_1 = arith.constant 0 : i32
    return %c0_i32, %c0_i32_0 : i32, i32
  }
  func.func @transform_6(%arg0: i32) -> (i32, i32) {
    %c0_i32 = arith.constant 0 : i32
    %c0_i32_0 = arith.constant 0 : i32
    %c0_i32_1 = arith.constant 0 : i32
    return %c0_i32, %c0_i32_0 : i32, i32
  }
  func.func @transform_7(%arg0: i32) -> (i32, i32) {
    %c0_i32 = arith.constant 0 : i32
    %c0_i32_0 = arith.constant 0 : i32
    return %arg0, %c0_i32 : i32, i32
  }
}

</mosaic_0001>

<bundles_post_ra>
// kernel: generator_forward.1
= control target key start
LH: loop header
LB: loop body
LE: loop exit
PB: predicated region body
PF: predicated region fallthrough
CT: control target
= control target key end

     0   :  { %v465_v0 = vmov 0.0   ;;  %vm466_vm0 = vmmov 0   ;;  %vm45_vm1 = vcmask 130048   ;;  %vm338_vm4 = vcmask 64512   ;;  %s599_s1 = inlined_call_operand.vmem [shape: bf16[16,128], index: 1, kind: input, shape index: {}]   ;;  %s600_s0 = inlined_call_operand.vmem [shape: f32[16,16], index: 0, kind: input, shape index: {}]   ;;  %s601_s3 = inlined_call_operand.vmem [shape: bf16[128,128], index: 3, kind: input, shape index: {}]   ;;  %s602_s2 = inlined_call_operand.vmem [shape: f32[1,128], index: 2, kind: input, shape index: {}]   ;;  %s603_s5 = inlined_call_operand.vmem [shape: bf16[128,8], index: 5, kind: input, shape index: {}]   ;;  %s604_s4 = inlined_call_operand.vmem [shape: f32[1,128], index: 4, kind: input, shape index: {}]   ;;  %s605_s6 = inlined_call_operand.vmem [shape: f32[1,8], index: 6, kind: input, shape index: {}]   ;;  %s606_s7 = inlined_call_operand.vmem [shape: f32[16,8], index: 7, kind: output, shape index: {}]  }
   0x1   :  { %388 = vmatprep.subr.bf16.mxu0 %v465_v0  ;;  %v436_v1 = vld [vmem:[%s599_s1] sm:$0xff]   ;;  %390 = vmatprep.mubr.msk.bf16.mxu0 %vm466_vm0, %v465_v0  ;;  %v28_v3 = vld [vmem:[%s600_s0 + $0x8] sm:$0xff]  ;;  %v437_v5 = vld [vmem:[%s601_s3 + $0x38] sm:$0xff]  }
   0x2   :  { %v27_v2 = vld [vmem:[%s600_s0] sm:$0xff]  ;;  %394 = vmatprep.subr.bf16.mxu1 %v465_v0  ;;  %410 = vmatprep.mubr.msk.bf16.mxu1 %vm466_vm0, %v465_v0  ;;  %v438_v6 = vld [vmem:[%s601_s3 + $0x30] sm:$0xff]   ;;  %v439_v7 = vld [vmem:[%s601_s3 + $0x28] sm:$0xff]  }
   0x3   :  { %389 = vmatpush3.bf16.msra.mxu0 %v436_v1  ;;  %v29_v4 = vpack.c.bf16 %v28_v3, %v27_v2  ;;  %395 = vmatpush3.bf16.msra.mxu1 %v437_v5  ;;  %v440_v8 = vld [vmem:[%s601_s3 + $0x20] sm:$0xff]   ;;  %v441_v9 = vld [vmem:[%s601_s3 + $0x18] sm:$0xff]   ;;  %v442_v10 = vld [vmem:[%s601_s3 + $0x10] sm:$0xff]  }
   0x4   :  { %414 = vmatprep.subr.bf16.mxu0 %v465_v0  ;;  %396 = vmatprep.subr.bf16.mxu1 %v465_v0  ;;  %v443_v11 = vld [vmem:[%s601_s3 + $0x8] sm:$0xff]   ;;  %v444_v12 = vld [vmem:[%s601_s3] sm:$0xff]   ;;  %v445_v31 = vld [vmem:[%s603_s5 + $0x38] sm:$0xff]  }
   0x5   :  { %v345_v13 = vld [vmem:[%s602_s2] ss:$0 sm:$0xff]  ;;  %v446_v32 = vld [vmem:[%s603_s5 + $0x30] sm:$0xff]   ;;  %v447_v33 = vld [vmem:[%s603_s5 + $0x28] sm:$0xff]  }
   0x6   :  { %391 = vmatmul.mubr.msk.bf16.vlgmr.msra.gmra.mxu0 %vm45_vm1, %v29_v4  ;;  %v448_v34 = vld [vmem:[%s603_s5 + $0x20] sm:$0xff]   ;;  %v449_v35 = vld [vmem:[%s603_s5 + $0x18] sm:$0xff]   ;;  %v450_v36 = vld [vmem:[%s603_s5 + $0x10] sm:$0xff]  }
   0x7   :  { %430 = vmatprep.mubr.msk.bf16.mxu0 %vm466_vm0, %v465_v0  ;;  %397 = vmatpush3.bf16.msra.mxu1 %v438_v6  ;;  %v451_v37 = vld [vmem:[%s603_s5 + $0x8] sm:$0xff]   ;;  %v452_v38 = vld [vmem:[%s603_s5] sm:$0xff]  }
   0x8   :  { %398 = vmatprep.subr.bf16.mxu1 %v465_v0  ;;  %415 = vmatpush3.bf16.msra.mxu0 %v445_v31  ;;  %v350_v39 = vld [vmem:[%s604_s4] ss:$0 sm:$0xff] }
   0x9   :  { %416 = vmatprep.subr.bf16.mxu0 %v465_v0  ;;  %v359_v57 = vld [vmem:[%s605_s6] ss:$0 sm:$0xff] }
   0xb   :  { %399 = vmatpush3.bf16.msra.mxu1 %v439_v7 }
   0xc   :  { %400 = vmatprep.subr.bf16.mxu1 %v465_v0  ;;  %417 = vmatpush3.bf16.msra.mxu0 %v446_v32 }
   0xd   :  { %418 = vmatprep.subr.bf16.mxu0 %v465_v0 }
   0xf   :  { %401 = vmatpush3.bf16.msra.mxu1 %v440_v8 }
  0x10   :  { %402 = vmatprep.subr.bf16.mxu1 %v465_v0  ;;  %419 = vmatpush3.bf16.msra.mxu0 %v447_v33 }
  0x11   :  { %420 = vmatprep.subr.bf16.mxu0 %v465_v0 }
  0x13   :  { %403 = vmatpush3.bf16.msra.mxu1 %v441_v9 }
  0x14   :  { %404 = vmatprep.subr.bf16.mxu1 %v465_v0  ;;  %421 = vmatpush3.bf16.msra.mxu0 %v448_v34 }
  0x15   :  { %422 = vmatprep.subr.bf16.mxu0 %v465_v0 }
  0x17   :  { %405 = vmatpush3.bf16.msra.mxu1 %v442_v10 }
  0x18   :  { %406 = vmatprep.subr.bf16.mxu1 %v465_v0  ;;  %423 = vmatpush3.bf16.msra.mxu0 %v449_v35 }
  0x19   :  { %424 = vmatprep.subr.bf16.mxu0 %v465_v0 }
  0x1b   :  { %407 = vmatpush3.bf16.msra.mxu1 %v443_v11 }
  0x1c   :  { %408 = vmatprep.subr.bf16.mxu1 %v465_v0  ;;  %425 = vmatpush3.bf16.msra.mxu0 %v450_v36 }
  0x1d   :  { %426 = vmatprep.subr.bf16.mxu0 %v465_v0 }
  0x1f   :  { %409 = vmatpush3.bf16.msra.mxu1 %v444_v12 }
  0x20   :  { %427 = vmatpush3.bf16.msra.mxu0 %v451_v37 }
  0x21   :  { %428 = vmatprep.subr.bf16.mxu0 %v465_v0 }
  0x24   :  { %429 = vmatpush3.bf16.msra.mxu0 %v452_v38 }
  0xc6   :  { %v83_v14 = vpop.f32.mrf.mxu0 }
  0xc7   :  { %v84_v15 = vadd.f32 %v345_v13, %v83_v14 }
  0xc8   :  { %v392_v16 = vpop.f32.mrf.mxu0 }
  0xc9   :  { %v92_v17 = vmin.f32 %v84_v15, 0.0  ;;  %vm90_vm2 = vcmp.gt.f32.partialorder %v84_v15, 0.0 }
  0xca   :  { %v86_v18 = vpop.f32.mrf.mxu0 }
  0xcb   :  { %v94_v19 = vmul.f32 1.442695, %v92_v17  ;;  %v87_v20 = vadd.f32 %v345_v13, %v86_v18 }
  0xcc   :  { %v393_v21 = vpop.f32.mrf.mxu0 }
  0xcd   :  { %453 = vpow2.f32 %v94_v19  ;;  %v93_v22 = vmin.f32 %v87_v20, 0.0  ;;  %vm91_vm3 = vcmp.gt.f32.partialorder %v87_v20, 0.0 }
  0xcf   :  { %v96_v23 = vmul.f32 1.442695, %v93_v22 }
  0xd1   :  { %455 = vpow2.f32 %v96_v23 }
  0xda   :  { %v454_v24 = vpop.eup %453 }
  0xdb   :  { %v348_v25 = vadd.f32 -1.0, %v454_v24 }
  0xdd   :  { %v100_v28 = vsel %vm90_vm2, %v84_v15, %v348_v25 }
  0xde   :  { %v456_v26 = vpop.eup %455 }
  0xdf   :  { %v349_v27 = vadd.f32 -1.0, %v456_v26 }
  0xe1   :  { %v101_v29 = vsel %vm91_vm3, %v87_v20, %v349_v27 }
  0xe2   :  { %v102_v30 = vpack.c.bf16 %v101_v29, %v100_v28 }
  0xe4   :  { %411 = vmatmul.mubr.bf16.vlgmr.msra.gmra.mxu1 %v102_v30 }
 0x1a4   :  { %v208_v40 = vpop.f32.mrf.mxu1 }
 0x1a5   :  { %v209_v41 = vadd.f32 %v350_v39, %v208_v40 }
 0x1a6   :  { %v412_v42 = vpop.f32.mrf.mxu1 }
 0x1a7   :  { %v215_v43 = vsub.f32 0.0, %v209_v41 }
 0x1a8   :  { %v211_v44 = vpop.f32.mrf.mxu1 }
 0x1a9   :  { %v217_v45 = vmul.f32 1.442695, %v215_v43  ;;  %v212_v46 = vadd.f32 %v350_v39, %v211_v44 }
 0x1aa   :  { %v413_v47 = vpop.f32.mrf.mxu1 }
 0x1ab   :  { %457 = vpow2.f32 %v217_v45  ;;  %v216_v48 = vsub.f32 0.0, %v212_v46 }
 0x1ad   :  { %v219_v49 = vmul.f32 1.442695, %v216_v48 }
 0x1af   :  { %459 = vpow2.f32 %v219_v49 }
 0x1b8   :  { %v458_v50 = vpop.eup %457 }
 0x1b9   :  { %v221_v51 = vadd.f32 1.0, %v458_v50 }
 0x1bb   :  { %461 = vrcp.f32 %v221_v51 }
 0x1bc   :  { %v460_v52 = vpop.eup %459 }
 0x1bd   :  { %v222_v53 = vadd.f32 1.0, %v460_v52 }
 0x1bf   :  { %463 = vrcp.f32 %v222_v53 }
 0x1c8   :  { %v462_v54 = vpop.eup %461 }
 0x1cc   :  { %v464_v55 = vpop.eup %463 }
 0x1cd   :  { %v225_v56 = vpack.c.bf16 %v464_v55, %v462_v54 }
 0x1cf   :  { %431 = vmatmul.mubr.bf16.vlgmr.msra.gmra.mxu0 %v225_v56 }
 0x28f   :  { %v331_v58 = vpop.f32.mrf.mxu0 }
 0x290   :  { %v332_v59 = vadd.f32 %v359_v57, %v331_v58 }
 0x291   :  { %v432_v60 = vpop.f32.mrf.mxu0 }
 0x292   :  { %339 = vst.msk [vmem:[%s606_s7] sm:$0xff] %vm338_vm4, %v332_v59 }
 0x293   :  { %v334_v61 = vpop.f32.mrf.mxu0 }
 0x294   :  { %v335_v62 = vadd.f32 %v359_v57, %v334_v61 }
 0x295   :  { %v433_v63 = vpop.f32.mrf.mxu0 }
 0x296   :  { %340 = vst.msk [vmem:[%s606_s7 + $0x8] sm:$0xff] %vm338_vm4, %v335_v62 }

</bundles_post_ra>
